<compile_context>
chip_gen: v6e
topology: v6e:2x2x1
jax: 0.10.0
libtpu: 0.0.40
codegen_flags: <defaults>
</compile_context>

<pallas_src>
import functools
import math

import jax
import jax.numpy as jnp
from jax.experimental import pallas as pl
from jax.experimental.pallas import tpu as pltpu

LOG_STD_MAX = 2.0
LOG_STD_MIN = -5.0
MEAN_MAX = 9.0
MEAN_MIN = -9.0
_HALF_LOG_2PI = 0.5 * math.log(2.0 * math.pi)
_LOG2 = math.log(2.0)


def _softplus(z):
    # numerically stable softplus (matches PyTorch TanhTransform log|det J| form)
    return jnp.maximum(z, 0.0) + jnp.log1p(jnp.exp(-jnp.abs(z)))


def _round_up(x, m):
    return ((x + m - 1) // m) * m


def actor_forward_kernel(
    state_ref, eps_ref,
    w1_ref, b1_ref, w2_ref, b2_ref,
    wh_ref, bh_ref,
    out_ref,
    *, action_dim, head_pad, out_width,
):
    A = action_dim
    HP = head_pad

    # --- MLP trunk: bf16 MXU matmuls, f32 accumulation, f32 elementwise ---
    x = state_ref[...].astype(jnp.bfloat16)
    h = jnp.dot(x, w1_ref[...], preferred_element_type=jnp.float32) + b1_ref[...]
    h = jnp.maximum(h, 0.0)
    h = jnp.dot(h.astype(jnp.bfloat16), w2_ref[...],
                preferred_element_type=jnp.float32) + b2_ref[...]
    h = jnp.maximum(h, 0.0)

    # --- fused, lane-padded heads: one (256, 2*HP) matmul.
    # mu occupies lanes [0, A) of tile 0, log_sigma lanes [0, A) of tile 1,
    # so both slices below are tile-aligned (no lane relayout).
    head = jnp.dot(h.astype(jnp.bfloat16), wh_ref[...],
                   preferred_element_type=jnp.float32) + bh_ref[...]
    mu = jnp.clip(head[:, :A], MEAN_MIN, MEAN_MAX)
    log_sigma = jnp.clip(head[:, HP:HP + A], LOG_STD_MIN, LOG_STD_MAX)
    sigma = jnp.exp(log_sigma)

    # --- tanh-Normal: rsample + log_prob (TanhTransform, cache_size=1) ---
    # All tail math is on narrow (TB, A) arrays -> the logp sum only covers the
    # A valid lanes (no padded-lane contamination).
    eps = eps_ref[...]
    pre_tanh = mu + sigma * eps              # rsample in the base (Normal) space
    action = jnp.tanh(pre_tanh)

    # base Normal log-prob at cached pre-tanh value; (pre_tanh - mu)/sigma == eps
    base_logp = -0.5 * eps * eps - log_sigma - _HALF_LOG_2PI
    # log |d tanh(x)/dx| = 2*(log 2 - x - softplus(-2x))  (exact PyTorch parity)
    log_det = 2.0 * (_LOG2 - pre_tanh - _softplus(-2.0 * pre_tanh))
    logp = base_logp - log_det
    logp_sum = jnp.sum(logp, axis=-1, keepdims=True)

    # --- single lane-dense (128-wide), unmasked output store ---
    tb = action.shape[0]
    pad = jnp.zeros((tb, out_width - 2 * A - 1), jnp.float32)
    out_ref[...] = jnp.concatenate([action, jnp.tanh(mu), logp_sum, pad], axis=-1)


def _choose_batch_tile(B, max_tile_rows=1024):
    """Pick the batch tile: as large as possible (per-step overhead dominates),
    but keep >= 2 grid steps for large B so the "parallel" batch axis can be
    sharded across v7x's two TensorCores."""
    if B <= 16:
        return B
    half = _round_up(pl.cdiv(B, 2), 8)
    return min(max_tile_rows, half, _round_up(B, 8))


def actor_forward(state, eps, params, *, max_tile_rows=1024):
    """Runs the Actor forward pass. Returns (action, logp_pi, a_tanh_mode)."""
    B, S = state.shape
    A = params["wmu"].shape[1]
    H = params["w1"].shape[1]

    # Head lane padding: each head gets its own 128-lane-aligned tile.
    HP = 128 * pl.cdiv(A, 128)
    OUT_W = 128 * pl.cdiv(2 * A + 1, 128)

    # Weights -> bf16 (halves resident weight DMA, native MXU rate); biases f32.
    w1 = params["w1"].astype(jnp.bfloat16)
    w2 = params["w2"].astype(jnp.bfloat16)
    wh = (jnp.zeros((H, 2 * HP), jnp.float32)
          .at[:, :A].set(params["wmu"])
          .at[:, HP:HP + A].set(params["wsig"])).astype(jnp.bfloat16)
    b1 = params["b1"].astype(jnp.float32)
    b2 = params["b2"].astype(jnp.float32)
    bh = (jnp.zeros((1, 2 * HP), jnp.float32)
          .at[:, :A].set(params["bmu"])
          .at[:, HP:HP + A].set(params["bsig"]))

    TB = _choose_batch_tile(B, max_tile_rows)
    grid = (pl.cdiv(B, TB),)

    def resident(arr):
        return pl.BlockSpec(arr.shape, lambda i: (0,) * arr.ndim)

    # NOTE: if a profile still shows exposed input DMA at large TB, bump the
    # streamed specs (state/eps/out) to pipeline_mode=pl.Buffered(3).
    slab = pl.pallas_call(
        functools.partial(actor_forward_kernel,
                          action_dim=A, head_pad=HP, out_width=OUT_W),
        out_shape=jax.ShapeDtypeStruct((B, OUT_W), jnp.float32),
        grid=grid,
        in_specs=[
            pl.BlockSpec((TB, S), lambda i: (i, 0)),   # state (streamed)
            pl.BlockSpec((TB, A), lambda i: (i, 0)),   # eps   (streamed)
            resident(w1), resident(b1),
            resident(w2), resident(b2),
            resident(wh), resident(bh),
        ],
        out_specs=pl.BlockSpec((TB, OUT_W), lambda i: (i, 0)),
        compiler_params=pltpu.CompilerParams(
            dimension_semantics=("parallel",)),
    )(state, eps, w1, b1, w2, b2, wh, bh)

    action = slab[:, :A]
    a_tanh_mode = slab[:, A:2 * A]
    logp_pi = slab[:, 2 * A]
    return action, logp_pi, a_tanh_mode


def init_actor_params(key, state_dim, action_dim, hidden=256):
    """Deterministic synthetic init mimicking nn.Linear default (uniform ±1/sqrt(fan_in))."""
    ks = jax.random.split(key, 8)

    def linear(kw, kb, fan_in, fan_out):
        bound = 1.0 / math.sqrt(fan_in)
        w = jax.random.uniform(kw, (fan_in, fan_out), jnp.float32, -bound, bound)
        b = jax.random.uniform(kb, (1, fan_out), jnp.float32, -bound, bound)
        return w, b

    w1, b1 = linear(ks[0], ks[1], state_dim, hidden)
    w2, b2 = linear(ks[2], ks[3], hidden, hidden)
    wmu, bmu = linear(ks[4], ks[5], hidden, action_dim)
    wsig, bsig = linear(ks[6], ks[7], hidden, action_dim)
    return dict(w1=w1, b1=b1, w2=w2, b2=b2, wmu=wmu, bmu=bmu, wsig=wsig, bsig=bsig)


if __name__ == "__main__":
    B, STATE_DIM, ACTION_DIM = 8, 16, 8

    key = jax.random.PRNGKey(0)
    k_params, k_state, k_eps = jax.random.split(key, 3)

    params = init_actor_params(k_params, STATE_DIM, ACTION_DIM)
    # state ingested as bf16 at the kernel boundary (cast fused into its producer);
    # the kernel truncates to bf16 before the MXU anyway, so numerics are unchanged.
    state = jax.random.normal(k_state, (B, STATE_DIM), jnp.float32).astype(jnp.bfloat16)
    eps = jax.random.normal(k_eps, (B, ACTION_DIM), jnp.float32)

    action, logp_pi, a_tanh_mode = actor_forward(state, eps, params)
    jax.block_until_ready((action, logp_pi, a_tanh_mode))

    assert action.shape == (B, ACTION_DIM)
    assert logp_pi.shape == (B,)
    assert a_tanh_mode.shape == (B, ACTION_DIM)
    assert bool(jnp.all(jnp.isfinite(action)))
    assert bool(jnp.all(jnp.isfinite(logp_pi)))
    assert bool(jnp.all(jnp.isfinite(a_tanh_mode)))
    assert bool(jnp.all(jnp.abs(action) <= 1.0))
    print("KERNEL_OK")
</pallas_src>

<mosaic_0001>
module attributes {stable_mosaic.version = 11 : i64} {
  func.func @actor_forward_kernel(%arg0: i32, %arg1: memref<8x16xbf16, #tpu.memory_space<vmem>>, %arg2: memref<8x8xf32, #tpu.memory_space<vmem>>, %arg3: memref<16x256xbf16, #tpu.memory_space<vmem>>, %arg4: memref<1x256xf32, #tpu.memory_space<vmem>>, %arg5: memref<256x256xbf16, #tpu.memory_space<vmem>>, %arg6: memref<1x256xf32, #tpu.memory_space<vmem>>, %arg7: memref<256x256xbf16, #tpu.memory_space<vmem>>, %arg8: memref<1x256xf32, #tpu.memory_space<vmem>>, %arg9: memref<8x128xf32, #tpu.memory_space<vmem>>) attributes {dimension_semantics = [#tpu.dimension_semantics<parallel>], iteration_bounds = array<i64: 1>, scalar_prefetch = 0 : i64, scratch_operands = 0 : i64, tpu.core_type = #tpu.core_type<tc>, window_params = [{transform_indices = @transform_0, window_bounds = array<i64: 8, 16>}, {transform_indices = @transform_1, window_bounds = array<i64: 8, 8>}, {pipeline_mode = #tpu.pipeline_mode<synchronous>, transform_indices = @transform_2, window_bounds = array<i64: 16, 256>}, {pipeline_mode = #tpu.pipeline_mode<synchronous>, transform_indices = @transform_3, window_bounds = array<i64: 1, 256>}, {pipeline_mode = #tpu.pipeline_mode<synchronous>, transform_indices = @transform_4, window_bounds = array<i64: 256, 256>}, {pipeline_mode = #tpu.pipeline_mode<synchronous>, transform_indices = @transform_5, window_bounds = array<i64: 1, 256>}, {pipeline_mode = #tpu.pipeline_mode<synchronous>, transform_indices = @transform_6, window_bounds = array<i64: 256, 256>}, {pipeline_mode = #tpu.pipeline_mode<synchronous>, transform_indices = @transform_7, window_bounds = array<i64: 1, 256>}, {transform_indices = @transform_8, window_bounds = array<i64: 8, 128>}]} {
    %c0 = arith.constant 0 : index
    %c0_0 = arith.constant 0 : index
    %0 = vector.load %arg1[%c0, %c0_0] : memref<8x16xbf16, #tpu.memory_space<vmem>>, vector<8x16xbf16>
    %c0_1 = arith.constant 0 : index
    %c0_2 = arith.constant 0 : index
    %1 = vector.load %arg3[%c0_1, %c0_2] : memref<16x256xbf16, #tpu.memory_space<vmem>>, vector<16x256xbf16>
    %cst = arith.constant dense<0.000000e+00> : vector<8x256xf32>
    %2 = tpu.matmul %0, %1, %cst {dimension_numbers = #tpu.dot_dimension_numbers<[1], [0], [0], [1], [0, 0, 1, 1], [], []>} : vector<8x16xbf16>, vector<16x256xbf16>, vector<8x256xf32> -> vector<8x256xf32>
    %c0_3 = arith.constant 0 : index
    %c0_4 = arith.constant 0 : index
    %3 = vector.load %arg4[%c0_3, %c0_4] : memref<1x256xf32, #tpu.memory_space<vmem>>, vector<1x256xf32>
    %4 = vector.broadcast %3 : vector<1x256xf32> to vector<8x256xf32>
    %5 = arith.addf %2, %4 : vector<8x256xf32>
    %cst_5 = arith.constant 0.000000e+00 : f32
    %6 = vector.broadcast %cst_5 : f32 to vector<8x256xf32>
    %7 = arith.maximumf %5, %6 : vector<8x256xf32>
    %8 = arith.truncf %7 : vector<8x256xf32> to vector<8x256xbf16>
    %c0_6 = arith.constant 0 : index
    %c0_7 = arith.constant 0 : index
    %9 = vector.load %arg5[%c0_6, %c0_7] : memref<256x256xbf16, #tpu.memory_space<vmem>>, vector<256x256xbf16>
    %cst_8 = arith.constant dense<0.000000e+00> : vector<8x256xf32>
    %10 = tpu.matmul %8, %9, %cst_8 {dimension_numbers = #tpu.dot_dimension_numbers<[1], [0], [0], [1], [0, 0, 1, 1], [], []>} : vector<8x256xbf16>, vector<256x256xbf16>, vector<8x256xf32> -> vector<8x256xf32>
    %c0_9 = arith.constant 0 : index
    %c0_10 = arith.constant 0 : index
    %11 = vector.load %arg6[%c0_9, %c0_10] : memref<1x256xf32, #tpu.memory_space<vmem>>, vector<1x256xf32>
    %12 = vector.broadcast %11 : vector<1x256xf32> to vector<8x256xf32>
    %13 = arith.addf %10, %12 : vector<8x256xf32>
    %cst_11 = arith.constant 0.000000e+00 : f32
    %14 = vector.broadcast %cst_11 : f32 to vector<8x256xf32>
    %15 = arith.maximumf %13, %14 : vector<8x256xf32>
    %16 = arith.truncf %15 : vector<8x256xf32> to vector<8x256xbf16>
    %c0_12 = arith.constant 0 : index
    %c0_13 = arith.constant 0 : index
    %17 = vector.load %arg7[%c0_12, %c0_13] : memref<256x256xbf16, #tpu.memory_space<vmem>>, vector<256x256xbf16>
    %cst_14 = arith.constant dense<0.000000e+00> : vector<8x256xf32>
    %18 = tpu.matmul %16, %17, %cst_14 {dimension_numbers = #tpu.dot_dimension_numbers<[1], [0], [0], [1], [0, 0, 1, 1], [], []>} : vector<8x256xbf16>, vector<256x256xbf16>, vector<8x256xf32> -> vector<8x256xf32>
    %c0_15 = arith.constant 0 : index
    %c0_16 = arith.constant 0 : index
    %19 = vector.load %arg8[%c0_15, %c0_16] : memref<1x256xf32, #tpu.memory_space<vmem>>, vector<1x256xf32>
    %20 = vector.broadcast %19 : vector<1x256xf32> to vector<8x256xf32>
    %21 = arith.addf %18, %20 : vector<8x256xf32>
    %22 = vector.extract_strided_slice %21 {offsets = [0, 0], sizes = [8, 8], strides = [1, 1]} : vector<8x256xf32> to vector<8x8xf32>
    %cst_17 = arith.constant -9.000000e+00 : f32
    %cst_18 = arith.constant 9.000000e+00 : f32
    %23 = vector.broadcast %cst_17 : f32 to vector<8x8xf32>
    %24 = arith.maximumf %23, %22 : vector<8x8xf32>
    %25 = vector.broadcast %cst_18 : f32 to vector<8x8xf32>
    %26 = arith.minimumf %25, %24 : vector<8x8xf32>
    %27 = vector.extract_strided_slice %21 {offsets = [0, 128], sizes = [8, 8], strides = [1, 1]} : vector<8x256xf32> to vector<8x8xf32>
    %cst_19 = arith.constant -5.000000e+00 : f32
    %cst_20 = arith.constant 2.000000e+00 : f32
    %28 = vector.broadcast %cst_19 : f32 to vector<8x8xf32>
    %29 = arith.maximumf %28, %27 : vector<8x8xf32>
    %30 = vector.broadcast %cst_20 : f32 to vector<8x8xf32>
    %31 = arith.minimumf %30, %29 : vector<8x8xf32>
    %32 = math.exp %31 : vector<8x8xf32>
    %c0_21 = arith.constant 0 : index
    %c0_22 = arith.constant 0 : index
    %33 = vector.load %arg2[%c0_21, %c0_22] : memref<8x8xf32, #tpu.memory_space<vmem>>, vector<8x8xf32>
    %34 = arith.mulf %32, %33 : vector<8x8xf32>
    %35 = arith.addf %26, %34 : vector<8x8xf32>
    %36 = math.tanh %35 : vector<8x8xf32>
    %cst_23 = arith.constant -5.000000e-01 : f32
    %37 = vector.broadcast %cst_23 : f32 to vector<8x8xf32>
    %38 = arith.mulf %37, %33 : vector<8x8xf32>
    %39 = arith.mulf %38, %33 : vector<8x8xf32>
    %40 = arith.subf %39, %31 : vector<8x8xf32>
    %cst_24 = arith.constant 0.918938517 : f32
    %41 = vector.broadcast %cst_24 : f32 to vector<8x8xf32>
    %42 = arith.subf %40, %41 : vector<8x8xf32>
    %cst_25 = arith.constant 0.693147182 : f32
    %43 = vector.broadcast %cst_25 : f32 to vector<8x8xf32>
    %44 = arith.subf %43, %35 : vector<8x8xf32>
    %cst_26 = arith.constant -2.000000e+00 : f32
    %45 = vector.broadcast %cst_26 : f32 to vector<8x8xf32>
    %46 = arith.mulf %45, %35 : vector<8x8xf32>
    %cst_27 = arith.constant 0.000000e+00 : f32
    %47 = vector.broadcast %cst_27 : f32 to vector<8x8xf32>
    %48 = arith.maximumf %46, %47 : vector<8x8xf32>
    %49 = math.absf %46 : vector<8x8xf32>
    %cst_28 = arith.constant 0.000000e+00 : f32
    %50 = vector.broadcast %cst_28 : f32 to vector<8x8xf32>
    %51 = arith.subf %50, %49 : vector<8x8xf32>
    %52 = math.exp %51 : vector<8x8xf32>
    %53 = math.log1p %52 : vector<8x8xf32>
    %54 = arith.addf %48, %53 : vector<8x8xf32>
    %55 = arith.subf %44, %54 : vector<8x8xf32>
    %cst_29 = arith.constant 2.000000e+00 : f32
    %56 = vector.broadcast %cst_29 : f32 to vector<8x8xf32>
    %57 = arith.mulf %56, %55 : vector<8x8xf32>
    %58 = arith.subf %42, %57 : vector<8x8xf32>
    %cst_30 = arith.constant dense<0.000000e+00> : vector<8xf32>
    %59 = vector.multi_reduction <add>, %58, %cst_30 [1] : vector<8x8xf32> to vector<8xf32>
    %60 = vector.shape_cast %59 : vector<8xf32> to vector<8x1xf32>
    %cst_31 = arith.constant 0.000000e+00 : f32
    %61 = vector.broadcast %cst_31 : f32 to vector<8x111xf32>
    %62 = math.tanh %26 : vector<8x8xf32>
    %63 = tpu.concatenate %36, %62, %60, %61 in 1 : vector<8x8xf32>, vector<8x8xf32>, vector<8x1xf32>, vector<8x111xf32> -> vector<8x128xf32>
    %c0_32 = arith.constant 0 : index
    %c0_33 = arith.constant 0 : index
    %64 = vector.load %arg9[%c0_32, %c0_33] : memref<8x128xf32, #tpu.memory_space<vmem>>, vector<8x128xf32>
    tpu.vector_store %arg9[%c0_32, %c0_33], %63 {strides = array<i32>} : memref<8x128xf32, #tpu.memory_space<vmem>>, vector<8x128xf32>,
    return
  }
  func.func @transform_0(%arg0: i32) -> (i32, i32) {
    %c0_i32 = arith.constant 0 : i32
    %c0_i32_0 = arith.constant 0 : i32
    return %arg0, %c0_i32 : i32, i32
  }
  func.func @transform_1(%arg0: i32) -> (i32, i32) {
    %c0_i32 = arith.constant 0 : i32
    %c0_i32_0 = arith.constant 0 : i32
    return %arg0, %c0_i32 : i32, i32
  }
  func.func @transform_2(%arg0: i32) -> (i32, i32) {
    %c0_i32 = arith.constant 0 : i32
    %c0_i32_0 = arith.constant 0 : i32
    %c0_i32_1 = arith.constant 0 : i32
    return %c0_i32, %c0_i32_0 : i32, i32
  }
  func.func @transform_3(%arg0: i32) -> (i32, i32) {
    %c0_i32 = arith.constant 0 : i32
    %c0_i32_0 = arith.constant 0 : i32
    %c0_i32_1 = arith.constant 0 : i32
    return %c0_i32, %c0_i32_0 : i32, i32
  }
  func.func @transform_4(%arg0: i32) -> (i32, i32) {
    %c0_i32 = arith.constant 0 : i32
    %c0_i32_0 = arith.constant 0 : i32
    %c0_i32_1 = arith.constant 0 : i32
    return %c0_i32, %c0_i32_0 : i32, i32
  }
  func.func @transform_5(%arg0: i32) -> (i32, i32) {
    %c0_i32 = arith.constant 0 : i32
    %c0_i32_0 = arith.constant 0 : i32
    %c0_i32_1 = arith.constant 0 : i32
    return %c0_i32, %c0_i32_0 : i32, i32
  }
  func.func @transform_6(%arg0: i32) -> (i32, i32) {
    %c0_i32 = arith.constant 0 : i32
    %c0_i32_0 = arith.constant 0 : i32
    %c0_i32_1 = arith.constant 0 : i32
    return %c0_i32, %c0_i32_0 : i32, i32
  }
  func.func @transform_7(%arg0: i32) -> (i32, i32) {
    %c0_i32 = arith.constant 0 : i32
    %c0_i32_0 = arith.constant 0 : i32
    %c0_i32_1 = arith.constant 0 : i32
    return %c0_i32, %c0_i32_0 : i32, i32
  }
  func.func @transform_8(%arg0: i32) -> (i32, i32) {
    %c0_i32 = arith.constant 0 : i32
    %c0_i32_0 = arith.constant 0 : i32
    return %arg0, %c0_i32 : i32, i32
  }
}

</mosaic_0001>

<bundles_post_ra>
// kernel: tpu_custom_call.1
= control target key start
LH: loop header
LB: loop body
LE: loop exit
PB: predicated region body
PF: predicated region fallthrough
CT: control target
= control target key end

     0   :  { %13 = vsyncpa [#allocation3], 0  ;;  %s1136_s0 = inlined_call_operand.hbm [shape: bf16[8,16], index: 0, kind: input, shape index: {}]   ;;  %s1137_s1 = inlined_call_operand.hbm [shape: f32[8,8], index: 1, kind: input, shape index: {}]   ;;  %s1138_s2 = inlined_call_operand.hbm [shape: bf16[16,256], index: 2, kind: input, shape index: {}]   ;;  %s1139_s3 = inlined_call_operand.vmem [shape: f32[1,256], index: 3, kind: input, shape index: {}]   ;;  %s1140_s4 = inlined_call_operand.hbm [shape: bf16[256,256], index: 4, kind: input, shape index: {}]   ;;  %s1141_s5 = inlined_call_operand.vmem [shape: f32[1,256], index: 5, kind: input, shape index: {}]   ;;  %s1142_s6 = inlined_call_operand.hbm [shape: bf16[256,256], index: 6, kind: input, shape index: {}]   ;;  %s1143_s7 = inlined_call_operand.vmem [shape: f32[1,256], index: 7, kind: input, shape index: {}]   ;;  %s1144_s8 = inlined_call_operand.hbm [shape: f32[8,128], index: 8, kind: output, shape index: {}]  }
   0x1   :  { %14 = vsyncpa [#allocation6], 0 }
   0x2   :  { %15 = vsyncpa [#allocation9], 0 }
   0x3   :  { %16 = vsyncpa [#allocation4], 0  ;;  %s1043_s27 = smov [#allocation5]  }
   0x4   :  { %s33_s28 = sshll.u32 %s1043_s27, 4  ;;  %s34_s28 = int_to_ptr.vmem [resolvable:$true] %s33_s28 }
   0x5   :  { %s923_s29 = scalar_lea.vmem %s34_s28, 128  ;;  %p928_p1 = scmp.lt.s32.totalorder %s34_s28, %s34_s28 }
   0x6   :  { %p924_p0 = scmp.ne.s32.totalorder %s34_s28, %s923_s29  ;;  %p929_p2 = scmp.lt.s32.totalorder %s923_s29, %s923_s29 }
   0x8   :  { %p930_p3 = por %p929_p2, %p928_p1 }
   0xa   :  { %p931_p4 = pnand %p930_p3, %p924_p0 }
   0xc   :  { %934 = shalt.err (!%p931_p4)
}
   0xd   :  { %36 = dma.hbm_to_vmem [thread:$0]  %s1137_s1, 128, %s34_s28, [#allocation6]  }
   0xe   :  { %s1044_s10 = smov [#allocation8]   ;;  %s1045_s12 = smov [#allocation2]  }
   0xf   :  { %s56_s11 = sshll.u32 %s1044_s10, 4  ;;  %s23_s13 = sshll.u32 %s1045_s12, 4  ;;  %s57_s11 = int_to_ptr.vmem [resolvable:$true] %s56_s11  ;;  %s24_s13 = int_to_ptr.vmem [resolvable:$true] %s23_s13 }
  0x10   :  { %s943_s14 = scalar_lea.vmem %s57_s11, 4096  ;;  %p948_p6 = scmp.lt.s32.totalorder %s57_s11, %s57_s11 }
  0x11   :  { %p944_p5 = scmp.ne.s32.totalorder %s57_s11, %s943_s14  ;;  %p949_p7 = scmp.lt.s32.totalorder %s943_s14, %s943_s14 }
  0x13   :  { %p950_p8 = por %p949_p7, %p948_p6 }
  0x15   :  { %p951_p9 = pnand %p950_p8, %p944_p5 }
  0x17   :  { %954 = shalt.err (!%p951_p9)
}
  0x18   :  { %s1046_s15 = smov 128   ;;  %s1047_s16 = smov 8  }
  0x19   :  { %62 = dma.hbm_to_vmem [thread:$0]  %s1140_s4, 4096, %s57_s11, [#allocation9], %s1046_s15, %s1046_s15, %s1047_s16  }
  0x1a   :  { %s963_s1 = scalar_lea.vmem %s24_s13, 64  ;;  %p968_p11 = scmp.lt.s32.totalorder %s24_s13, %s24_s13 }
  0x1b   :  { %p964_p10 = scmp.ne.s32.totalorder %s24_s13, %s963_s1  ;;  %p969_p12 = scmp.lt.s32.totalorder %s963_s1, %s963_s1 }
  0x1d   :  { %p970_p13 = por %p969_p12, %p968_p11 }
  0x1f   :  { %p971_p0 = pnand %p970_p13, %p964_p10 }
  0x21   :  { %974 = shalt.err (!%p971_p0)
}
  0x22   :  { %26 = dma.hbm_to_vmem [thread:$0]  %s1136_s0, 64, %s24_s13, [#allocation3]  }
  0x23   :  { %s1048_s21 = smov [#allocation7]   ;;  %s1049_s23 = smov [#allocation10]  }
  0x24   :  { %s42_s22 = sshll.u32 %s1048_s21, 4  ;;  %s70_s24 = sshll.u32 %s1049_s23, 4  ;;  %s43_s22 = int_to_ptr.vmem [resolvable:$true] %s42_s22  ;;  %s71_s24 = int_to_ptr.vmem [resolvable:$true] %s70_s24 }
  0x25   :  { %s983_s25 = scalar_lea.vmem %s43_s22, 256  ;;  %p988_p2 = scmp.lt.s32.totalorder %s43_s22, %s43_s22 }
  0x26   :  { %p984_p1 = scmp.ne.s32.totalorder %s43_s22, %s983_s25  ;;  %p989_p3 = scmp.lt.s32.totalorder %s983_s25, %s983_s25 }
  0x28   :  { %p990_p4 = por %p989_p3, %p988_p2 }
  0x2a   :  { %p991_p5 = pnand %p990_p4, %p984_p1 }
  0x2c   :  { %994 = shalt.err (!%p991_p5)
}
  0x2d   :  { %48 = dma.hbm_to_vmem [thread:$0]  %s1138_s2, 256, %s43_s22, [#allocation6], %s1046_s15, %s1046_s15, %s1047_s16  }
  0x2e   :  { %s1003_s0 = scalar_lea.vmem %s71_s24, 4096  ;;  %p1008_p7 = scmp.lt.s32.totalorder %s71_s24, %s71_s24 }
  0x2f   :  { %p1004_p6 = scmp.ne.s32.totalorder %s71_s24, %s1003_s0  ;;  %p1009_p8 = scmp.lt.s32.totalorder %s1003_s0, %s1003_s0 }
  0x31   :  { %p1010_p9 = por %p1009_p8, %p1008_p7 }
  0x33   :  { %p1011_p10 = pnand %p1010_p9, %p1004_p6 }
  0x35   :  { %1014 = shalt.err (!%p1011_p10)
}
  0x36   :  { %76 = dma.hbm_to_vmem [thread:$0]  %s1142_s6, 4096, %s71_s24, [#allocation9], %s1046_s15, %s1046_s15, %s1047_s16  }
  0x37   :  { %1035 = dma.done.wait [#allocation3], 64  }
  0x38   :  { %1036 = vsyncadd [#allocation3], 4294967232 }
  0x39   :  { %1037 = dma.done.wait [#allocation6], 384  }
  0x3a   :  { %1038 = vsyncadd [#allocation6], 4294966912 }
  0x3b   :  { %1039 = dma.done.wait [#allocation9], 8192  }
  0x3c   :  { %1040 = vsyncadd [#allocation9], 4294959104  ;;  %v1050_v0 = vmov 0   ;;  %v806_v1 = vld [vmem:[#allocation7 + $0x4] ss:$8 sps:$4 sm:$0xff]   ;;  %vm120_vm0 = vcmask 130048  }
  0x3d   :  { %156 = vmatprep.mubr.bf16.mxu0 %v1050_v0  ;;  %v808_v2 = vld [vmem:[#allocation7] ss:$8 sps:$4 sm:$0xff]   ;;  %v95_v3 = vld [vmem:[#allocation2] sm:$0xf]  ;;  %138 = vmatprep.subr.bf16.mxu0 %v806_v1  ;;  %v809_v4 = vld [vmem:[#allocation8 + $0x74] ss:$8 sps:$4 sm:$0xff]   ;;  %v100_v0 = vlaneseq }
  0x3e   :  { %v811_v5 = vld [vmem:[#allocation8 + $0x70] ss:$8 sps:$4 sm:$0xff]   ;;  %139 = vmatpush1.bf16.msra.mxu0 %v808_v2  ;;  %v812_v6 = vld [vmem:[#allocation8 + $0x64] ss:$8 sps:$4 sm:$0xff]   ;;  %373 = vmatprep.subr.bf16.mxu1 %v809_v4  ;;  %v814_v7 = vld [vmem:[#allocation8 + $0x60] ss:$8 sps:$4 sm:$0xff]  }
  0x3f   :  { %374 = vmatpush1.bf16.msra.mxu1 %v811_v5  ;;  %v815_v8 = vld [vmem:[#allocation8 + $0x54] ss:$8 sps:$4 sm:$0xff]   ;;  %v817_v9 = vld [vmem:[#allocation8 + $0x50] ss:$8 sps:$4 sm:$0xff]   ;;  %v818_v10 = vld [vmem:[#allocation8 + $0x44] ss:$8 sps:$4 sm:$0xff]  }
  0x40   :  { %375 = vmatprep.subr.bf16.mxu1 %v812_v6  ;;  %v820_v11 = vld [vmem:[#allocation8 + $0x40] ss:$8 sps:$4 sm:$0xff]   ;;  %v821_v12 = vld [vmem:[#allocation8 + $0x34] ss:$8 sps:$4 sm:$0xff]   ;;  %v823_v13 = vld [vmem:[#allocation8 + $0x30] ss:$8 sps:$4 sm:$0xff]  }
  0x41   :  { %730 = vmatmul.mubr.msk.bf16.vlgmr.msra.gmra.mxu0 %vm120_vm0, %v95_v3  ;;  %v824_v14 = vld [vmem:[#allocation8 + $0x24] ss:$8 sps:$4 sm:$0xff]   ;;  %v826_v15 = vld [vmem:[#allocation8 + $0x20] ss:$8 sps:$4 sm:$0xff]   ;;  %v827_v16 = vld [vmem:[#allocation8 + $0x14] ss:$8 sps:$4 sm:$0xff]  }
  0x42   :  { %v829_v17 = vld [vmem:[#allocation8 + $0x10] ss:$8 sps:$4 sm:$0xff]   ;;  %v830_v18 = vld [vmem:[#allocation8 + $0x4] ss:$8 sps:$4 sm:$0xff]   ;;  %v832_v19 = vld [vmem:[#allocation8] ss:$8 sps:$4 sm:$0xff]  }
  0x43   :  { %376 = vmatpush1.bf16.msra.mxu1 %v814_v7  ;;  %v833_v20 = vld [vmem:[#allocation8 + $0xf4] ss:$8 sps:$4 sm:$0xff]   ;;  %v835_v21 = vld [vmem:[#allocation8 + $0xf0] ss:$8 sps:$4 sm:$0xff]   ;;  %v836_v22 = vld [vmem:[#allocation8 + $0xe4] ss:$8 sps:$4 sm:$0xff]  }
  0x44   :  { %377 = vmatprep.subr.bf16.mxu1 %v815_v8  ;;  %v838_v23 = vld [vmem:[#allocation8 + $0xe0] ss:$8 sps:$4 sm:$0xff]   ;;  %v839_v24 = vld [vmem:[#allocation8 + $0xd4] ss:$8 sps:$4 sm:$0xff]   ;;  %v841_v25 = vld [vmem:[#allocation8 + $0xd0] ss:$8 sps:$4 sm:$0xff]  }
  0x45   :  { %v842_v26 = vld [vmem:[#allocation8 + $0xc4] ss:$8 sps:$4 sm:$0xff]   ;;  %v844_v27 = vld [vmem:[#allocation8 + $0xc0] ss:$8 sps:$4 sm:$0xff]   ;;  %v845_v28 = vld [vmem:[#allocation8 + $0xb4] ss:$8 sps:$4 sm:$0xff]  }
  0x46   :  { %v847_v29 = vld [vmem:[#allocation8 + $0xb0] ss:$8 sps:$4 sm:$0xff]   ;;  %v848_v30 = vld [vmem:[#allocation8 + $0xa4] ss:$8 sps:$4 sm:$0xff]   ;;  %v850_v31 = vld [vmem:[#allocation8 + $0xa0] ss:$8 sps:$4 sm:$0xff]  }
  0x47   :  { %378 = vmatpush1.bf16.msra.mxu1 %v817_v9  ;;  %v851_v32 = vld [vmem:[#allocation8 + $0x94] ss:$8 sps:$4 sm:$0xff]   ;;  %v853_v33 = vld [vmem:[#allocation8 + $0x90] ss:$8 sps:$4 sm:$0xff]   ;;  %v854_v34 = vld [vmem:[#allocation8 + $0x84] ss:$8 sps:$4 sm:$0xff]  }
  0x48   :  { %379 = vmatprep.subr.bf16.mxu1 %v818_v10  ;;  %v856_v35 = vld [vmem:[#allocation8 + $0x80] ss:$8 sps:$4 sm:$0xff]   ;;  %v857_v36 = vld [vmem:[#allocation10 + $0x70] ss:$8 sps:$4 sm:$0xff]   ;;  %v859_v37 = vld [vmem:[#allocation10 + $0x74] ss:$8 sps:$4 sm:$0xff]  }
  0x49   :  { %v862_v38 = vld [vmem:[#allocation10 + $0x64] ss:$8 sps:$4 sm:$0xff]   ;;  %622 = vmatprep.subr.bf16.mxu0 %v859_v37  ;;  %v860_v39 = vld [vmem:[#allocation10 + $0x60] ss:$8 sps:$4 sm:$0xff]   ;;  %v865_v40 = vld [vmem:[#allocation10 + $0x54] ss:$8 sps:$4 sm:$0xff]  }
  0x4a   :  { %623 = vmatpush1.bf16.msra.mxu0 %v857_v36  ;;  %v863_v41 = vld [vmem:[#allocation10 + $0x50] ss:$8 sps:$4 sm:$0xff]   ;;  %v868_v42 = vld [vmem:[#allocation10 + $0x44] ss:$8 sps:$4 sm:$0xff]   ;;  %v866_v43 = vld [vmem:[#allocation10 + $0x40] ss:$8 sps:$4 sm:$0xff]  }
  0x4b   :  { %380 = vmatpush1.bf16.msra.mxu1 %v820_v11  ;;  %624 = vmatprep.subr.bf16.mxu0 %v862_v38  ;;  %v871_v44 = vld [vmem:[#allocation10 + $0x34] ss:$8 sps:$4 sm:$0xff]   ;;  %v869_v45 = vld [vmem:[#allocation10 + $0x30] ss:$8 sps:$4 sm:$0xff]   ;;  %v874_v46 = vld [vmem:[#allocation10 + $0x24] ss:$8 sps:$4 sm:$0xff]  }
  0x4c   :  { %381 = vmatprep.subr.bf16.mxu1 %v821_v12  ;;  %v872_v47 = vld [vmem:[#allocation10 + $0x20] ss:$8 sps:$4 sm:$0xff]   ;;  %v877_v48 = vld [vmem:[#allocation10 + $0x14] ss:$8 sps:$4 sm:$0xff]   ;;  %v875_v49 = vld [vmem:[#allocation10 + $0x10] ss:$8 sps:$4 sm:$0xff]  }
  0x4d   :  { %v880_v50 = vld [vmem:[#allocation10 + $0x4] ss:$8 sps:$4 sm:$0xff]   ;;  %v878_v51 = vld [vmem:[#allocation10] ss:$8 sps:$4 sm:$0xff]   ;;  %v883_v52 = vld [vmem:[#allocation10 + $0xf4] ss:$8 sps:$4 sm:$0xff]  }
  0x4e   :  { %625 = vmatpush1.bf16.msra.mxu0 %v860_v39  ;;  %v881_v53 = vld [vmem:[#allocation10 + $0xf0] ss:$8 sps:$4 sm:$0xff]   ;;  %v886_v54 = vld [vmem:[#allocation10 + $0xe4] ss:$8 sps:$4 sm:$0xff]   ;;  %v884_v55 = vld [vmem:[#allocation10 + $0xe0] ss:$8 sps:$4 sm:$0xff]  }
  0x4f   :  { %382 = vmatpush1.bf16.msra.mxu1 %v823_v13  ;;  %626 = vmatprep.subr.bf16.mxu0 %v865_v40  ;;  %v889_v56 = vld [vmem:[#allocation10 + $0xd4] ss:$8 sps:$4 sm:$0xff]   ;;  %v887_v57 = vld [vmem:[#allocation10 + $0xd0] ss:$8 sps:$4 sm:$0xff]   ;;  %v892_v58 = vld [vmem:[#allocation10 + $0xc4] ss:$8 sps:$4 sm:$0xff]  }
  0x50   :  { %383 = vmatprep.subr.bf16.mxu1 %v824_v14  ;;  %v890_v59 = vld [vmem:[#allocation10 + $0xc0] ss:$8 sps:$4 sm:$0xff]   ;;  %v895_v60 = vld [vmem:[#allocation10 + $0xb4] ss:$8 sps:$4 sm:$0xff]   ;;  %v893_v61 = vld [vmem:[#allocation10 + $0xb0] ss:$8 sps:$4 sm:$0xff]  }
  0x51   :  { %v898_v62 = vld [vmem:[#allocation10 + $0xa4] ss:$8 sps:$4 sm:$0xff]   ;;  %v896_v63 = vld [vmem:[#allocation10 + $0xa0] ss:$8 sps:$4 sm:$0xff]   ;;  %v101_v1 = vshrl.u32 %v100_v0, 7  ;;  %vm697_vm2 = vcmask 64512  }
  0x52   :  { %627 = vmatpush1.bf16.msra.mxu0 %v863_v41  ;;  %v98_v3 = vld [vmem:[%s1139_s3] sm:$0x3]  ;;  %vm708_vm3 = vcmask 138240  }
  0x53   :  { %384 = vmatpush1.bf16.msra.mxu1 %v826_v15  ;;  %628 = vmatprep.subr.bf16.mxu0 %v868_v42  ;;  %v102_v2 = vsub.s32 0, %v101_v1  ;;  %v106_v4 = vsub.s32 1, %v101_v1 }
  0x54   :  { %385 = vmatprep.subr.bf16.mxu1 %v827_v16 }
  0x55   :  { %v103_v5 = vrot.slane %v98_v3, %v102_v2  ;;  %v107_v6 = vrot.slane %v98_v3, %v106_v4 }
  0x56   :  { %629 = vmatpush1.bf16.msra.mxu0 %v866_v43 }
  0x57   :  { %386 = vmatpush1.bf16.msra.mxu1 %v829_v17  ;;  %630 = vmatprep.subr.bf16.mxu0 %v871_v44  ;;  %v901_v17 = vld [vmem:[#allocation10 + $0x94] ss:$8 sps:$4 sm:$0xff]  }
  0x58   :  { %387 = vmatprep.subr.bf16.mxu1 %v830_v18  ;;  %v899_v18 = vld [vmem:[#allocation10 + $0x90] ss:$8 sps:$4 sm:$0xff]  }
  0x5a   :  { %631 = vmatpush1.bf16.msra.mxu0 %v869_v45 }
  0x5b   :  { %388 = vmatpush1.bf16.msra.mxu1 %v832_v19  ;;  %632 = vmatprep.subr.bf16.mxu0 %v874_v46  ;;  %v904_v19 = vld [vmem:[#allocation10 + $0x84] ss:$8 sps:$4 sm:$0xff]  }
  0x5c   :  { %389 = vmatprep.subr.bf16.mxu1 %v833_v20  ;;  %v902_v20 = vld [vmem:[#allocation10 + $0x80] ss:$8 sps:$4 sm:$0xff]  }
  0x5e   :  { %633 = vmatpush1.bf16.msra.mxu0 %v872_v47  ;;  %v669_v47 = vld [vmem:[#allocation5] sm:$0xff] }
  0x5f   :  { %390 = vmatpush2.bf16.msra.mxu1 %v835_v21  ;;  %634 = vmatprep.subr.bf16.mxu0 %v877_v48  ;;  %v201_v21 = vld [vmem:[%s1141_s5] sm:$0x3]  ;;  %s1051_s5 = smov [#allocation11]  }
  0x60   :  { %391 = vmatprep.subr.bf16.mxu1 %v836_v22  ;;  %v206_v22 = vrot.slane %v201_v21, %v102_v2 }
  0x62   :  { %635 = vmatpush1.bf16.msra.mxu0 %v875_v49 }
  0x63   :  { %392 = vmatpush2.bf16.msra.mxu1 %v838_v23  ;;  %636 = vmatprep.subr.bf16.mxu0 %v880_v50  ;;  %v210_v23 = vrot.slane %v201_v21, %v106_v4 }
  0x64   :  { %393 = vmatprep.subr.bf16.mxu1 %v839_v24 }
  0x66   :  { %637 = vmatpush1.bf16.msra.mxu0 %v878_v51 }
  0x67   :  { %394 = vmatpush2.bf16.msra.mxu1 %v841_v25  ;;  %638 = vmatprep.subr.bf16.mxu0 %v883_v52 }
  0x68   :  { %395 = vmatprep.subr.bf16.mxu1 %v842_v26 }
  0x6a   :  { %639 = vmatpush2.bf16.msra.mxu0 %v881_v53 }
  0x6b   :  { %396 = vmatpush2.bf16.msra.mxu1 %v844_v27  ;;  %640 = vmatprep.subr.bf16.mxu0 %v886_v54 }
  0x6c   :  { %397 = vmatprep.subr.bf16.mxu1 %v845_v28 }
  0x6e   :  { %641 = vmatpush2.bf16.msra.mxu0 %v884_v55 }
  0x6f   :  { %398 = vmatpush2.bf16.msra.mxu1 %v847_v29  ;;  %642 = vmatprep.subr.bf16.mxu0 %v889_v56 }
  0x70   :  { %399 = vmatprep.subr.bf16.mxu1 %v848_v30 }
  0x72   :  { %643 = vmatpush2.bf16.msra.mxu0 %v887_v57 }
  0x73   :  { %400 = vmatpush2.bf16.msra.mxu1 %v850_v31  ;;  %644 = vmatprep.subr.bf16.mxu0 %v892_v58  ;;  %v673_v58 = vmul.f32 -0.5, %v669_v47 }
  0x74   :  { %401 = vmatprep.subr.bf16.mxu1 %v851_v32 }
  0x76   :  { %645 = vmatpush2.bf16.msra.mxu0 %v890_v59 }
  0x77   :  { %402 = vmatpush2.bf16.msra.mxu1 %v853_v33  ;;  %646 = vmatprep.subr.bf16.mxu0 %v895_v60 }
  0x78   :  { %403 = vmatprep.subr.bf16.mxu1 %v854_v34  ;;  %v450_v34 = vld [vmem:[%s1143_s7] sm:$0x3]  ;;  %s717_s7 = sshll.u32 %s1051_s5, 4  ;;  %s718_s7 = int_to_ptr.vmem [resolvable:$true] %s717_s7 }
  0x79   :  { %v455_v44 = vrot.slane %v450_v34, %v102_v2  ;;  %s1015_s10 = scalar_lea.vmem %s718_s7, 128  ;;  %p1020_p12 = scmp.lt.s32.totalorder %s718_s7, %s718_s7 }
  0x7a   :  { %647 = vmatpush2.bf16.msra.mxu0 %v893_v61  ;;  %p1016_p11 = scmp.ne.s32.totalorder %s718_s7, %s1015_s10  ;;  %p1021_p13 = scmp.lt.s32.totalorder %s1015_s10, %s1015_s10 }
  0x7b   :  { %404 = vmatpush2.bf16.msra.mxu1 %v856_v35  ;;  %648 = vmatprep.subr.bf16.mxu0 %v898_v62  ;;  %v459_v35 = vrot.slane %v450_v34, %v106_v4  ;;  %v674_v62 = vmul.f32 %v673_v58, %v669_v47 }
  0x7c   :  { %p1022_p0 = por %p1021_p13, %p1020_p12 }
  0x7e   :  { %649 = vmatpush2.bf16.msra.mxu0 %v896_v63  ;;  %p1023_p1 = pnand %p1022_p0, %p1016_p11 }
  0x7f   :  { %650 = vmatprep.subr.bf16.mxu0 %v901_v17 }
  0x82   :  { %651 = vmatpush2.bf16.msra.mxu0 %v899_v18 }
  0x83   :  { %652 = vmatprep.subr.bf16.mxu0 %v904_v19 }
  0x86   :  { %653 = vmatpush2.bf16.msra.mxu0 %v902_v20 }
 0x101   :  { %v158_v7 = vpop.f32.mrf.mxu0 }
 0x102   :  { %v159_v8 = vadd.f32 %v158_v7, %v103_v5 }
 0x103   :  { %v160_v9 = vpop.f32.mrf.mxu0 }
 0x104   :  { %v161_v10 = vadd.f32 %v160_v9, %v107_v6  ;;  %v165_v11 = vmax.f32 %v159_v8, 0.0 }
 0x105   :  { %v162_v12 = vpop.f32.mrf.mxu0 }
 0x106   :  { %v166_v13 = vmax.f32 %v161_v10, 0.0  ;;  %v167_v16 = vpack.c.bf16 %v165_v11, %v165_v11 }
 0x107   :  { %v163_v14 = vpop.f32.mrf.mxu0 }
 0x108   :  { %v168_v15 = vpack.c.bf16 %v166_v13, %v166_v13 }
 0x10a   :  { %405 = vmatprep.mubr.bf16.mxu1 %v168_v15 }
 0x10b   :  { %406 = vmatmul.mubr.bf16.vlgmr.msra.gmra.mxu1 %v167_v16 }
 0x1cb   :  { %v407_v24 = vpop.f32.mrf.mxu1 }
 0x1cc   :  { %v408_v25 = vadd.f32 %v407_v24, %v206_v22 }
 0x1cd   :  { %v409_v26 = vpop.f32.mrf.mxu1 }
 0x1ce   :  { %v410_v27 = vadd.f32 %v409_v26, %v210_v23  ;;  %v414_v28 = vmax.f32 %v408_v25, 0.0 }
 0x1cf   :  { %v411_v29 = vpop.f32.mrf.mxu1 }
 0x1d0   :  { %v415_v30 = vmax.f32 %v410_v27, 0.0  ;;  %v416_v33 = vpack.c.bf16 %v414_v28, %v414_v28 }
 0x1d1   :  { %v412_v31 = vpop.f32.mrf.mxu1 }
 0x1d2   :  { %v417_v32 = vpack.c.bf16 %v415_v30, %v415_v30 }
 0x1d4   :  { %654 = vmatprep.mubr.bf16.mxu0 %v417_v32 }
 0x1d5   :  { %655 = vmatmul.mubr.bf16.vlgmr.msra.gmra.mxu0 %v416_v33 }
 0x295   :  { %v656_v36 = vpop.f32.mrf.mxu0 }
 0x296   :  { %v657_v45 = vadd.f32 %v656_v36, %v455_v44 }
 0x297   :  { %v658_v37 = vpop.f32.mrf.mxu0 }
 0x298   :  { %v659_v38 = vadd.f32 %v658_v37, %v459_v35  ;;  %v795_v48 = vclamps-f32 %v657_v45, 9.0 }
 0x299   :  { %v660_v39 = vpop.f32.mrf.mxu0 }
 0x29a   :  { %v665_v40 = vmax.f32 %v659_v38, -5.0 }
 0x29b   :  { %v661_v41 = vpop.f32.mrf.mxu0 }
 0x29c   :  { %v666_v42 = vmin.f32 %v665_v40, 2.0 }
 0x29e   :  { %v667_v43 = vmul.f32 1.442695, %v666_v42  ;;  %v675_v3 = vsub.f32 %v674_v62, %v666_v42 }
 0x2a0   :  { %905 = vpow2.f32 %v667_v43  ;;  %v796_v7 = vadd.f32 -0.9189385, %v675_v3 }
 0x2ad   :  { %v906_v46 = vpop.eup %905 }
 0x2ae   :  { %v670_v49 = vmul.f32 %v906_v46, %v669_v47 }
 0x2b0   :  { %v671_v50 = vadd.f32 %v795_v48, %v670_v49 }
 0x2b2   :  { %v678_v51 = vmul.f32 -2.0, %v671_v50  ;;  %v677_v4 = vsub.f32 0.6931472, %v671_v50 }
 0x2b4   :  { %v680_v52 = vand.u32 2147483647, %v678_v51  ;;  %v679_v1 = vmax.f32 %v678_v51, 0.0 }
 0x2b6   :  { %v681_v53 = vsub.f32 0.0, %v680_v52 }
 0x2b8   :  { %v682_v54 = vmul.f32 1.442695, %v681_v53 }
 0x2ba   :  { %907 = vpow2.f32 %v682_v54 }
 0x2c7   :  { %v908_v55 = vpop.eup %907 }
 0x2c8   :  { %v684_v56 = vadd.f32 1.0, %v908_v55  ;;  %v687_v57 = vmul.f32 -0.5, %v908_v55  ;;  %v690_v60 = vand.u32 2147483647, %v908_v55 }
 0x2ca   :  { %909 = vlog2.f32 %v684_v56  ;;  %v688_v59 = vadd.f32 1.0, %v687_v57  ;;  %vm691_vm1 = vcmp.lt.f32.partialorder %v690_v60, 0.0004427343 }
 0x2cb   :  { %911 = vtanh.f32 %v795_v48 }
 0x2cc   :  { %v689_v0 = vmul.f32 %v908_v55, %v688_v59  ;;  %913 = vtanh.f32 %v671_v50 }
 0x2d7   :  { %v910_v61 = vpop.eup %909 }
 0x2d8   :  { %v686_v63 = vmul.f32 0.6931472, %v910_v61  ;;  %v912_v11 = vpop.eup %911 }
 0x2d9   :  { %v914_v13 = vpop.eup %913 }
 0x2da   :  { %v692_v2 = vsel %vm691_vm1, %v689_v0, %v686_v63 }
 0x2db   :  { %v693_v5 = vadd.f32 %v692_v2, %v679_v1 }
 0x2dd   :  { %v694_v6 = vsub.f32 %v677_v4, %v693_v5 }
 0x2df   :  { %v695_v8 = vmul.f32 2.0, %v694_v6 }
 0x2e1   :  { %v696_v9 = vsub.f32 %v796_v7, %v695_v8 }
 0x2e3   :  { %v698_v10 = vsel %vm697_vm2, %v696_v9, 0.0 }
 0x2e4   :  { %699 = vadd.xlane.f32.xlu0 %v698_v10 }
 0x2fa   :  { %703 = vrot.lane.b32.xlu0 %v912_v11, %s1047_s16 }
 0x36d   :  { %v700_v12 = vpop.xlane.xlu0 %699 }
 0x371   :  { %v704_v14 = vpop.permute.xlu0 %703 }
 0x372   :  { %v706_v15 = vsel %vm697_vm2, %v914_v13, %v704_v14 }
 0x373   :  { %v707_v16 = vsel %vm120_vm0, %v706_v15, %v700_v12 }
 0x374   :  { %v709_v17 = vsel %vm708_vm3, %v707_v16, 0.0 }
 0x375   :  { %710 = vst [vmem:[#allocation11] sm:$0xff] %v709_v17 }
 0x376   :  { %1026 = shalt.err (!%p1023_p1)
}
 0x377   :  { %720 = dma.vmem_to_hbm [thread:$0]  %s718_s7, 128, %s1144_s8, [#allocation4]  }
 0x378   :  { %1041 = dma.done.wait [#allocation4], 128  }
 0x379   :  { %1042 = vsyncadd [#allocation4], 4294967168 }
 0x37a   :  { %724 = vsyncpa [#allocation3], 1 }
 0x37b   :  { %725 = vsyncpa [#allocation6], 1 }
 0x37c   :  { %726 = vsyncpa [#allocation9], 1 }
 0x37d   :  { %727 = vsyncpa [#allocation4], 1 }

</bundles_post_ra>
